<compile_context>
chip_gen: v5e
topology: v5e:2x2
jax: 0.10.0
libtpu: 0.0.40
codegen_flags: <defaults>
</compile_context>

<pallas_src>
import jax
import jax.numpy as jnp
from jax import lax
from jax.experimental import pallas as pl
from jax.experimental.pallas import tpu as pltpu

HIDDEN = 768
PROJ = 128


def _round_up(x, m):
    return ((x + m - 1) // m) * m


def _cosine_head_kernel(xa_ref, xp_ref, w_ref, b_ref, out_ref):
    """Fused fc1 + L2-normalize + cosine-similarity for one batch tile.

    xa_ref, xp_ref : (TB, 768)  pooled CLS embeddings (abstract / paraphrase)
    w_ref          : (768, 128) fc1 weight (stored transposed: x @ W)
    b_ref          : (1, 128)   fc1 bias
    out_ref        : (TB, 1)    cosine similarity score
    """
    xa = xa_ref[...]
    xp = xp_ref[...]
    w = w_ref[...]
    b = b_ref[...]

    # Two MXU matmuls sharing the same resident (768,128) RHS.  No in-kernel
    # concat/slice copies: ha/hp are the direct matmul outputs.
    ha = jnp.dot(xa, w, preferred_element_type=jnp.float32) + b   # (TB, 128)
    hp = jnp.dot(xp, w, preferred_element_type=jnp.float32) + b   # (TB, 128)

    # F.normalize(dim=1): inv = 1 / max(||h||, 1e-12) == rsqrt(max(||h||^2, 1e-24)).
    dot_ap = jnp.sum(ha * hp, axis=1, keepdims=True)              # (TB, 1)
    ssa = jnp.sum(ha * ha, axis=1, keepdims=True)                 # (TB, 1)
    ssp = jnp.sum(hp * hp, axis=1, keepdims=True)                 # (TB, 1)
    inv_a = lax.rsqrt(jnp.maximum(ssa, 1e-24))                    # EUP
    inv_p = lax.rsqrt(jnp.maximum(ssp, 1e-24))                    # EUP

    cos_n = dot_ap * inv_a * inv_p                                # <n_a, n_p>
    # nn.CosineSimilarity(dim=1)'s own 1e-8 floor on ||n_a||*||n_p||
    # (matters only when ||h|| < 1e-12; per-row scalars, negligible cost).
    na_norm = jnp.sqrt(ssa) * inv_a                               # ||n_a||
    np_norm = jnp.sqrt(ssp) * inv_p                               # ||n_p||
    denom = jnp.maximum(na_norm * np_norm, 1e-8)

    out_ref[...] = (cos_n / denom).astype(out_ref.dtype)


def cosine_similarity_head(pooled_abstract, pooled_paraphrase, w1, b1,
                           *, block_b=1024):
    """pooled_*: (B, 768) float32; w1: (768, 128); b1: (128,). Returns (B,)."""
    B = pooled_abstract.shape[0]

    # Batch tile: multiple of 8 (sublane), capped at block_b, and split so the
    # grid has >= 2 steps whenever B > 8 (keeps both v7x TensorCores busy via
    # the "parallel" batch axis).  VMEM budget at tb=1024:
    # 2 inputs x 2 buffers x 1024x768x4B ~= 12 MiB + resident weights.
    tb = min(block_b, max(8, _round_up(pl.cdiv(B, 2), 8)))
    nb = pl.cdiv(B, tb)   # ragged last block handled by Pallas — no jnp.pad

    b1_2d = b1.reshape(1, PROJ)

    out = pl.pallas_call(
        _cosine_head_kernel,
        out_shape=jax.ShapeDtypeStruct((B, 1), jnp.float32),
        grid=(nb,),
        in_specs=[
            pl.BlockSpec((tb, HIDDEN), lambda i: (i, 0)),       # abstract tile
            pl.BlockSpec((tb, HIDDEN), lambda i: (i, 0)),       # paraphrase tile
            pl.BlockSpec((HIDDEN, PROJ), lambda i: (0, 0)),     # W1 (resident)
            pl.BlockSpec((1, PROJ), lambda i: (0, 0)),          # b1 (resident)
        ],
        out_specs=pl.BlockSpec((tb, 1), lambda i: (i, 0)),
        compiler_params=pltpu.CompilerParams(
            dimension_semantics=("parallel",),      # independent batch tiles
            vmem_limit_bytes=32 * 1024 * 1024,
        ),
    )(pooled_abstract, pooled_paraphrase, w1, b1_2d)
    return out[:, 0]


# ----------------------------------------------------------------------------
# Mock "BERT" backbone (plain JAX glue).  The real module wraps an arbitrary
# PreTrainedModel and uses last_hidden_state[:, 0]; here a deterministic
# embedding lookup of the first token stands in for that pooled CLS vector.
# TODO(synk): full transformer encoder backbone is external and not reproduced;
# its CLS gather is therefore not fused into the kernel (the real backbone
# would produce pooled outputs in HBM regardless).
# ----------------------------------------------------------------------------
def mock_bert_pooled(input_ids, attention_mask, emb_table):
    del attention_mask  # unused by the mock backbone
    cls_ids = input_ids[:, 0]                      # CLS position, as in [:, 0]
    return jnp.take(emb_table, cls_ids, axis=0)    # (B, 768)


def similarity_model_cosine(input_ids_abs, mask_abs, input_ids_par, mask_par,
                            emb_table, w1, b1):
    pooled_abs = mock_bert_pooled(input_ids_abs, mask_abs, emb_table)
    pooled_par = mock_bert_pooled(input_ids_par, mask_par, emb_table)
    return cosine_similarity_head(pooled_abs, pooled_par, w1, b1)


def _reference(input_ids_abs, mask_abs, input_ids_par, mask_par, emb_table, w1, b1):
    pa = mock_bert_pooled(input_ids_abs, mask_abs, emb_table)
    pp = mock_bert_pooled(input_ids_par, mask_par, emb_table)
    ha = pa @ w1 + b1
    hp = pp @ w1 + b1
    na = ha / jnp.maximum(jnp.linalg.norm(ha, axis=1, keepdims=True), 1e-12)
    np_ = hp / jnp.maximum(jnp.linalg.norm(hp, axis=1, keepdims=True), 1e-12)
    dot = jnp.sum(na * np_, axis=1)
    denom = jnp.maximum(
        jnp.linalg.norm(na, axis=1) * jnp.linalg.norm(np_, axis=1), 1e-8)
    return dot / denom


def _run_case(key, B, S, VOCAB, emb_table, w1, b1):
    k_ids_a, k_ids_p = jax.random.split(key, 2)
    ids_a = jax.random.randint(k_ids_a, (B, S), 0, VOCAB, dtype=jnp.int32)
    ids_p = jax.random.randint(k_ids_p, (B, S), 0, VOCAB, dtype=jnp.int32)
    mask = jnp.ones((B, S), dtype=jnp.int32)

    score = similarity_model_cosine(ids_a, mask, ids_p, mask, emb_table, w1, b1)
    score = jax.block_until_ready(score)
    ref = _reference(ids_a, mask, ids_p, mask, emb_table, w1, b1)

    assert score.shape == (B,), score.shape
    assert jnp.allclose(score, ref, atol=1e-5, rtol=1e-5), (score, ref)


if __name__ == "__main__":
    key = jax.random.PRNGKey(0)
    k_emb, k_w, k_b, k_case1, k_case2, k_case3 = jax.random.split(key, 6)

    S, VOCAB = 8, 100

    # Deterministic parameter init (fc1: Linear(768, 128), stored transposed).
    emb_table = jax.random.normal(k_emb, (VOCAB, HIDDEN), dtype=jnp.float32) * 0.02
    w1 = jax.random.normal(k_w, (HIDDEN, PROJ), dtype=jnp.float32) * 0.02
    b1 = jax.random.normal(k_b, (PROJ,), dtype=jnp.float32) * 0.02

    _run_case(k_case1, 2, S, VOCAB, emb_table, w1, b1)     # tiny batch (1 step)
    _run_case(k_case2, 10, S, VOCAB, emb_table, w1, b1)    # 2 steps, ragged last block
    _run_case(k_case3, 300, S, VOCAB, emb_table, w1, b1)   # multi-step pipeline

    print("KERNEL_OK")
</pallas_src>

<mosaic_0001>
module attributes {stable_mosaic.version = 11 : i64} {
  func.func @_cosine_head_kernel(%arg0: i32, %arg1: memref<8x768xf32, #tpu.memory_space<vmem>>, %arg2: memref<8x768xf32, #tpu.memory_space<vmem>>, %arg3: memref<768x128xf32, #tpu.memory_space<vmem>>, %arg4: memref<1x128xf32, #tpu.memory_space<vmem>>, %arg5: memref<8x1xf32, #tpu.memory_space<vmem>>) attributes {dimension_semantics = [#tpu.dimension_semantics<parallel>], iteration_bounds = array<i64: 1>, scalar_prefetch = 0 : i64, scratch_operands = 0 : i64, tpu.core_type = #tpu.core_type<tc>, window_params = [{transform_indices = @transform_0, window_bounds = array<i64: 8, 768>}, {transform_indices = @transform_1, window_bounds = array<i64: 8, 768>}, {pipeline_mode = #tpu.pipeline_mode<synchronous>, transform_indices = @transform_2, window_bounds = array<i64: 768, 128>}, {pipeline_mode = #tpu.pipeline_mode<synchronous>, transform_indices = @transform_3, window_bounds = array<i64: 1, 128>}, {transform_indices = @transform_4, window_bounds = array<i64: 8, 1>}]} {
    %c0 = arith.constant 0 : index
    %c0_0 = arith.constant 0 : index
    %0 = vector.load %arg1[%c0, %c0_0] : memref<8x768xf32, #tpu.memory_space<vmem>>, vector<8x768xf32>
    %c0_1 = arith.constant 0 : index
    %c0_2 = arith.constant 0 : index
    %1 = vector.load %arg2[%c0_1, %c0_2] : memref<8x768xf32, #tpu.memory_space<vmem>>, vector<8x768xf32>
    %c0_3 = arith.constant 0 : index
    %c0_4 = arith.constant 0 : index
    %2 = vector.load %arg3[%c0_3, %c0_4] : memref<768x128xf32, #tpu.memory_space<vmem>>, vector<768x128xf32>
    %c0_5 = arith.constant 0 : index
    %c0_6 = arith.constant 0 : index
    %3 = vector.load %arg4[%c0_5, %c0_6] : memref<1x128xf32, #tpu.memory_space<vmem>>, vector<1x128xf32>
    %cst = arith.constant dense<0.000000e+00> : vector<8x128xf32>
    %4 = tpu.matmul %0, %2, %cst {dimension_numbers = #tpu.dot_dimension_numbers<[1], [0], [0], [1], [0, 0, 1, 1], [], []>} : vector<8x768xf32>, vector<768x128xf32>, vector<8x128xf32> -> vector<8x128xf32>
    %5 = vector.broadcast %3 : vector<1x128xf32> to vector<8x128xf32>
    %6 = arith.addf %4, %5 : vector<8x128xf32>
    %cst_7 = arith.constant dense<0.000000e+00> : vector<8x128xf32>
    %7 = tpu.matmul %1, %2, %cst_7 {dimension_numbers = #tpu.dot_dimension_numbers<[1], [0], [0], [1], [0, 0, 1, 1], [], []>} : vector<8x768xf32>, vector<768x128xf32>, vector<8x128xf32> -> vector<8x128xf32>
    %8 = vector.broadcast %3 : vector<1x128xf32> to vector<8x128xf32>
    %9 = arith.addf %7, %8 : vector<8x128xf32>
    %10 = arith.mulf %6, %9 : vector<8x128xf32>
    %cst_8 = arith.constant dense<0.000000e+00> : vector<8xf32>
    %11 = vector.multi_reduction <add>, %10, %cst_8 [1] : vector<8x128xf32> to vector<8xf32>
    %12 = vector.shape_cast %11 : vector<8xf32> to vector<8x1xf32>
    %13 = arith.mulf %6, %6 : vector<8x128xf32>
    %cst_9 = arith.constant dense<0.000000e+00> : vector<8xf32>
    %14 = vector.multi_reduction <add>, %13, %cst_9 [1] : vector<8x128xf32> to vector<8xf32>
    %15 = vector.shape_cast %14 : vector<8xf32> to vector<8x1xf32>
    %16 = arith.mulf %9, %9 : vector<8x128xf32>
    %cst_10 = arith.constant dense<0.000000e+00> : vector<8xf32>
    %17 = vector.multi_reduction <add>, %16, %cst_10 [1] : vector<8x128xf32> to vector<8xf32>
    %18 = vector.shape_cast %17 : vector<8xf32> to vector<8x1xf32>
    %cst_11 = arith.constant 1.000000e-24 : f32
    %19 = vector.broadcast %cst_11 : f32 to vector<8x1xf32>
    %20 = arith.maximumf %15, %19 : vector<8x1xf32>
    %21 = math.rsqrt %20 : vector<8x1xf32>
    %cst_12 = arith.constant 1.000000e-24 : f32
    %22 = vector.broadcast %cst_12 : f32 to vector<8x1xf32>
    %23 = arith.maximumf %18, %22 : vector<8x1xf32>
    %24 = math.rsqrt %23 : vector<8x1xf32>
    %25 = arith.mulf %12, %21 : vector<8x1xf32>
    %26 = arith.mulf %25, %24 : vector<8x1xf32>
    %27 = math.sqrt %15 : vector<8x1xf32>
    %28 = arith.mulf %27, %21 : vector<8x1xf32>
    %29 = math.sqrt %18 : vector<8x1xf32>
    %30 = arith.mulf %29, %24 : vector<8x1xf32>
    %31 = arith.mulf %28, %30 : vector<8x1xf32>
    %cst_13 = arith.constant 9.99999993E-9 : f32
    %32 = vector.broadcast %cst_13 : f32 to vector<8x1xf32>
    %33 = arith.maximumf %31, %32 : vector<8x1xf32>
    %34 = arith.divf %26, %33 : vector<8x1xf32>
    %c0_14 = arith.constant 0 : index
    %c0_15 = arith.constant 0 : index
    %35 = vector.load %arg5[%c0_14, %c0_15] : memref<8x1xf32, #tpu.memory_space<vmem>>, vector<8x1xf32>
    tpu.vector_store %arg5[%c0_14, %c0_15], %34 {strides = array<i32>} : memref<8x1xf32, #tpu.memory_space<vmem>>, vector<8x1xf32>,
    return
  }
  func.func @transform_0(%arg0: i32) -> (i32, i32) {
    %c0_i32 = arith.constant 0 : i32
    %c0_i32_0 = arith.constant 0 : i32
    return %arg0, %c0_i32 : i32, i32
  }
  func.func @transform_1(%arg0: i32) -> (i32, i32) {
    %c0_i32 = arith.constant 0 : i32
    %c0_i32_0 = arith.constant 0 : i32
    return %arg0, %c0_i32 : i32, i32
  }
  func.func @transform_2(%arg0: i32) -> (i32, i32) {
    %c0_i32 = arith.constant 0 : i32
    %c0_i32_0 = arith.constant 0 : i32
    %c0_i32_1 = arith.constant 0 : i32
    return %c0_i32, %c0_i32_0 : i32, i32
  }
  func.func @transform_3(%arg0: i32) -> (i32, i32) {
    %c0_i32 = arith.constant 0 : i32
    %c0_i32_0 = arith.constant 0 : i32
    %c0_i32_1 = arith.constant 0 : i32
    return %c0_i32, %c0_i32_0 : i32, i32
  }
  func.func @transform_4(%arg0: i32) -> (i32, i32) {
    %c0_i32 = arith.constant 0 : i32
    %c0_i32_0 = arith.constant 0 : i32
    return %arg0, %c0_i32 : i32, i32
  }
}

</mosaic_0001>

<bundles_post_ra>
// kernel: tpu_custom_call.1
= control target key start
LH: loop header
LB: loop body
LE: loop exit
PB: predicated region body
PF: predicated region fallthrough
CT: control target
= control target key end

     0   :  { %9 = vsyncpa [#allocation3], 0  ;;  %s1145_s0 = inlined_call_operand.hbm [shape: f32[2,768], index: 0, kind: input, shape index: {}]   ;;  %s1146_s1 = inlined_call_operand.hbm [shape: f32[2,768], index: 1, kind: input, shape index: {}]   ;;  %s1147_s2 = inlined_call_operand.hbm [shape: f32[768,128], index: 2, kind: input, shape index: {}]   ;;  %s1148_s3 = inlined_call_operand.vmem [shape: f32[1,128], index: 3, kind: input, shape index: {}]   ;;  %s1149_s4 = inlined_call_operand.vmem [shape: f32[2,1], index: 4, kind: output, shape index: {}]  }
   0x1   :  { %10 = vsyncpa [#allocation5], 0 }
   0x2   :  { %14 = vsyncadd [#allocation3], 576  ;;  %s15_s17 = sshll.u32 %s1145_s0, 4  ;;  %s705_s18 = smov [#allocation2]   ;;  %s16_s17 = int_to_ptr.hbm [resolvable:$true] %s15_s17 }
   0x3   :  { %s17_s19 = sshll.u32 %s705_s18, 4  ;;  %s706_s20 = smov 192   ;;  %s18_s19 = int_to_ptr.vmem [resolvable:$true] %s17_s19 }
   0x4   :  { %s707_s21 = smov 12  }
   0x5   :  { %23 = dma.hbm_to_vmem [thread:$0]  %s16_s17, 192, %s18_s19, [#allocation3], %s706_s20, %s706_s20, %s707_s21  }
   0x6   :  { %27 = vsyncadd [#allocation5], 576  ;;  %s28_s24 = sshll.u32 %s1146_s1, 4  ;;  %s708_s25 = smov [#allocation4]   ;;  %s29_s24 = int_to_ptr.hbm [resolvable:$true] %s28_s24 }
   0x7   :  { %s30_s26 = sshll.u32 %s708_s25, 4  ;;  %s41_s0 = sshll.u32 %s1147_s2, 4  ;;  %s31_s26 = int_to_ptr.vmem [resolvable:$true] %s30_s26  ;;  %s42_s0 = int_to_ptr.hbm [resolvable:$true] %s41_s0 }
   0x8   :  { %36 = dma.hbm_to_vmem [thread:$0]  %s29_s24, 192, %s31_s26, [#allocation5], %s706_s20, %s706_s20, %s707_s21  }
   0x9   :  { %s709_s29 = smov [#allocation6]   ;;  %s710_s5 = smov 128  }
   0xa   :  { %s43_s30 = sshll.u32 %s709_s29, 4  ;;  %s711_s6 = smov 8   ;;  %s44_s30 = int_to_ptr.vmem [resolvable:$true] %s43_s30 }
   0xb   :  { %49 = dma.hbm_to_vmem [thread:$0]  %s42_s0, 12288, %s44_s30, [#allocation5], %s710_s5, %s710_s5, %s711_s6  }
   0xc   :  { %701 = dma.done.wait [#allocation3], 768  }
   0xd   :  { %702 = vsyncadd [#allocation3], 4294966528 }
   0xe   :  { %703 = dma.done.wait [#allocation5], 13056  }
   0xf   :  { %704 = vsyncadd [#allocation5], 4294954240  ;;  %v746_v0 = vld [vmem:[#allocation6 + $0x78] sm:$0xff]  ;;  %v750_v2 = vld [vmem:[#allocation6 + $0x70] sm:$0xff]  ;;  %vm566_vm14 = vcmask 7168  }
  0x10   :  { %v748_v1 = vld [vmem:[#allocation6 + $0x178] sm:$0xff]  ;;  %215 = vmatpush.msra.mxu0 %v746_v0  ;;  %v756_v4 = vld [vmem:[#allocation6 + $0x170] sm:$0xff]  ;;  %v762_v6 = vld [vmem:[#allocation6 + $0x68] sm:$0xff] }
  0x11   :  { %255 = vmatpush.msra.mxu2 %v748_v1  ;;  %v754_v3 = vld [vmem:[#allocation6 + $0xf8] sm:$0xff]  ;;  %v764_v7 = vld [vmem:[#allocation6 + $0xf0] sm:$0xff]  ;;  %v766_v8 = vld [vmem:[#allocation6 + $0x168] sm:$0xff] }
  0x12   :  { %v758_v5 = vld [vmem:[#allocation6 + $0x1f8] sm:$0xff]  ;;  %235 = vmatpush.msra.mxu1 %v754_v3  ;;  %216 = vmatpush.msra.mxu0 %v750_v2  ;;  %v770_v9 = vld [vmem:[#allocation6 + $0x1f0] sm:$0xff]  ;;  %v772_v10 = vld [vmem:[#allocation6 + $0xe8] sm:$0xff] }
  0x13   :  { %275 = vmatpush.msra.mxu3 %v758_v5  ;;  %256 = vmatpush.msra.mxu2 %v756_v4  ;;  %v776_v11 = vld [vmem:[#allocation6 + $0x60] sm:$0xff]  ;;  %v780_v13 = vld [vmem:[#allocation6 + $0x1e8] sm:$0xff]  ;;  %v790_v16 = vld [vmem:[#allocation6 + $0x58] sm:$0xff] }
  0x14   :  { %236 = vmatpush.msra.mxu1 %v764_v7  ;;  %v778_v12 = vld [vmem:[#allocation6 + $0x160] sm:$0xff]  ;;  %217 = vmatpush.msra.mxu0 %v762_v6  ;;  %v792_v17 = vld [vmem:[#allocation6 + $0x158] sm:$0xff]  ;;  %v802_v20 = vld [vmem:[#allocation6 + $0x50] sm:$0xff] }
  0x15   :  { %276 = vmatpush.msra.mxu3 %v770_v9  ;;  %257 = vmatpush.msra.mxu2 %v766_v8  ;;  %v784_v14 = vld [vmem:[#allocation6 + $0xe0] sm:$0xff]  ;;  %v796_v18 = vld [vmem:[#allocation6 + $0xd8] sm:$0xff]  ;;  %v804_v21 = vld [vmem:[#allocation6 + $0x150] sm:$0xff] }
  0x16   :  { %v786_v15 = vld [vmem:[#allocation6 + $0x1e0] sm:$0xff]  ;;  %237 = vmatpush.msra.mxu1 %v772_v10  ;;  %218 = vmatpush.msra.mxu0 %v776_v11  ;;  %v798_v19 = vld [vmem:[#allocation6 + $0x1d8] sm:$0xff]  ;;  %v808_v22 = vld [vmem:[#allocation6 + $0xd0] sm:$0xff] }
  0x17   :  { %277 = vmatpush.msra.mxu3 %v780_v13  ;;  %258 = vmatpush.msra.mxu2 %v778_v12  ;;  %v810_v23 = vld [vmem:[#allocation6 + $0x1d0] sm:$0xff]  ;;  %v814_v24 = vld [vmem:[#allocation6 + $0x48] sm:$0xff]  ;;  %v826_v28 = vld [vmem:[#allocation6 + $0x40] sm:$0xff] }
  0x18   :  { %238 = vmatpush.msra.mxu1 %v784_v14  ;;  %219 = vmatpush.msra.mxu0 %v790_v16  ;;  %v816_v25 = vld [vmem:[#allocation6 + $0x148] sm:$0xff]  ;;  %v828_v29 = vld [vmem:[#allocation6 + $0x140] sm:$0xff]  ;;  %v838_v32 = vld [vmem:[#allocation6 + $0x38] sm:$0xff] }
  0x19   :  { %278 = vmatpush.msra.mxu3 %v786_v15  ;;  %259 = vmatpush.msra.mxu2 %v792_v17  ;;  %v820_v26 = vld [vmem:[#allocation6 + $0xc8] sm:$0xff]  ;;  %v832_v30 = vld [vmem:[#allocation6 + $0xc0] sm:$0xff]  ;;  %v840_v33 = vld [vmem:[#allocation6 + $0x138] sm:$0xff] }
  0x1a   :  { %239 = vmatpush.msra.mxu1 %v796_v18  ;;  %220 = vmatpush.msra.mxu0 %v802_v20  ;;  %v822_v27 = vld [vmem:[#allocation6 + $0x1c8] sm:$0xff]  ;;  %v834_v31 = vld [vmem:[#allocation6 + $0x1c0] sm:$0xff]  ;;  %1170 = vst [vmem:[#allocation12_spill] sm:$0xff] %v840_v33  ;;  %v844_v34 = vld [vmem:[#allocation6 + $0xb8] sm:$0xff] }
  0x1b   :  { %279 = vmatpush.msra.mxu3 %v798_v19  ;;  %260 = vmatpush.msra.mxu2 %v804_v21  ;;  %1168 = vst [vmem:[#allocation10_spill] sm:$0xff] %v822_v27  ;;  %v846_v35 = vld [vmem:[#allocation6 + $0x1b8] sm:$0xff]  ;;  %v850_v36 = vld [vmem:[#allocation6 + $0x30] sm:$0xff]  ;;  %v862_v40 = vld [vmem:[#allocation6 + $0x28] sm:$0xff] }
  0x1c   :  { %240 = vmatpush.msra.mxu1 %v808_v22  ;;  %221 = vmatpush.msra.mxu0 %v814_v24  ;;  %1169 = vst [vmem:[#allocation11_spill] sm:$0xff] %v834_v31  ;;  %v852_v37 = vld [vmem:[#allocation6 + $0x130] sm:$0xff]  ;;  %v864_v41 = vld [vmem:[#allocation6 + $0x128] sm:$0xff]  ;;  %v874_v44 = vld [vmem:[#allocation6 + $0x20] sm:$0xff] }
  0x1d   :  { %280 = vmatpush.msra.mxu3 %v810_v23  ;;  %261 = vmatpush.msra.mxu2 %v816_v25  ;;  %1171 = vst [vmem:[#allocation13_spill] sm:$0xff] %v846_v35  ;;  %v856_v38 = vld [vmem:[#allocation6 + $0xb0] sm:$0xff]  ;;  %v868_v42 = vld [vmem:[#allocation6 + $0xa8] sm:$0xff]  ;;  %v876_v45 = vld [vmem:[#allocation6 + $0x120] sm:$0xff] }
  0x1e   :  { %241 = vmatpush.msra.mxu1 %v820_v26  ;;  %222 = vmatpush.msra.mxu0 %v826_v28  ;;  %1172 = vst [vmem:[#allocation14_spill] sm:$0xff] %v852_v37  ;;  %v858_v39 = vld [vmem:[#allocation6 + $0x1b0] sm:$0xff]  ;;  %v870_v43 = vld [vmem:[#allocation6 + $0x1a8] sm:$0xff]  ;;  %v880_v46 = vld [vmem:[#allocation6 + $0xa0] sm:$0xff] }
  0x1f   :  { %281 = vmatpush.msra.mxu3 %v822_v27  ;;  %262 = vmatpush.msra.mxu2 %v828_v29  ;;  %1173 = vst [vmem:[#allocation15_spill] sm:$0xff] %v858_v39  ;;  %v882_v47 = vld [vmem:[#allocation6 + $0x1a0] sm:$0xff]  ;;  %v886_v48 = vld [vmem:[#allocation6 + $0x18] sm:$0xff]  ;;  %v898_v52 = vld [vmem:[#allocation6 + $0x10] sm:$0xff] }
  0x20   :  { %242 = vmatpush.msra.mxu1 %v832_v30  ;;  %223 = vmatpush.msra.mxu0 %v838_v32  ;;  %1174 = vst [vmem:[#allocation16_spill] sm:$0xff] %v864_v41  ;;  %v888_v49 = vld [vmem:[#allocation6 + $0x118] sm:$0xff]  ;;  %v900_v53 = vld [vmem:[#allocation6 + $0x110] sm:$0xff]  ;;  %v910_v56 = vld [vmem:[#allocation6 + $0x8] sm:$0xff] }
  0x21   :  { %282 = vmatpush.msra.mxu3 %v834_v31  ;;  %263 = vmatpush.msra.mxu2 %v840_v33  ;;  %1175 = vst [vmem:[#allocation17_spill] sm:$0xff] %v870_v43  ;;  %v892_v50 = vld [vmem:[#allocation6 + $0x98] sm:$0xff]  ;;  %v904_v54 = vld [vmem:[#allocation6 + $0x90] sm:$0xff]  ;;  %v912_v57 = vld [vmem:[#allocation6 + $0x108] sm:$0xff] }
  0x22   :  { %243 = vmatpush.msra.mxu1 %v844_v34  ;;  %224 = vmatpush.msra.mxu0 %v850_v36  ;;  %1176 = vst [vmem:[#allocation18_spill] sm:$0xff] %v876_v45  ;;  %v894_v51 = vld [vmem:[#allocation6 + $0x198] sm:$0xff]  ;;  %v906_v55 = vld [vmem:[#allocation6 + $0x190] sm:$0xff]  ;;  %v916_v58 = vld [vmem:[#allocation6] sm:$0xff] }
  0x23   :  { %283 = vmatpush.msra.mxu3 %v846_v35  ;;  %264 = vmatpush.msra.mxu2 %v852_v37  ;;  %1177 = vst [vmem:[#allocation19_spill] sm:$0xff] %v882_v47  ;;  %v918_v59 = vld [vmem:[#allocation6 + $0x88] sm:$0xff]  ;;  %v924_v61 = vld [vmem:[#allocation6 + $0x100] sm:$0xff]  ;;  %v73_v33 = vld [vmem:[#allocation4 + $0x8] sm:$0xf] }
  0x24   :  { %244 = vmatpush.msra.mxu1 %v856_v38  ;;  %225 = vmatpush.msra.mxu0 %v862_v40  ;;  %1178 = vst [vmem:[#allocation20_spill] sm:$0xff] %v888_v49  ;;  %v920_v60 = vld [vmem:[#allocation6 + $0x188] sm:$0xff]  ;;  %v64_v62 = vld [vmem:[#allocation2] sm:$0xff]  ;;  %v77_v27 = vld [vmem:[#allocation4 + $0x20] sm:$0xf] }
  0x25   :  { %284 = vmatpush.msra.mxu3 %v858_v39  ;;  %265 = vmatpush.msra.mxu2 %v864_v41  ;;  %1179 = vst [vmem:[#allocation21_spill] sm:$0xff] %v894_v51  ;;  %v66_v63 = vld [vmem:[#allocation2 + $0xc] sm:$0xff]  ;;  %v962_v39 = vld [vmem:[#allocation6 + $0x2e0] sm:$0xff] }
  0x26   :  { %245 = vmatpush.msra.mxu1 %v868_v42  ;;  %226 = vmatpush.msra.mxu0 %v874_v44  ;;  %1180 = vst [vmem:[#allocation22_spill] sm:$0xff] %v900_v53  ;;  %v966_v41 = vld [vmem:[#allocation6 + $0x250] sm:$0xff]  ;;  %v76_v35 = vld [vmem:[#allocation4 + $0x18] sm:$0xff] }
  0x27   :  { %285 = vmatpush.msra.mxu3 %v870_v43  ;;  %266 = vmatpush.msra.mxu2 %v876_v45  ;;  %1181 = vst [vmem:[#allocation23_spill] sm:$0xff] %v906_v55  ;;  %v938_v43 = vld [vmem:[#allocation6 + $0x270] sm:$0xff]  ;;  %v982_v37 = vld [vmem:[#allocation6 + $0x248] sm:$0xff] }
  0x28   :  { %246 = vmatpush.msra.mxu1 %v880_v46  ;;  %227 = vmatpush.msra.mxu0 %v886_v48  ;;  %1182 = vst [vmem:[#allocation24_spill] sm:$0xff] %v912_v57  ;;  %v67_v45 = vld [vmem:[#allocation2 + $0x14] sm:$0xf]  ;;  %v990_v31 = vld [vmem:[#allocation6 + $0x2c8] sm:$0xff] }
  0x29   :  { %286 = vmatpush.msra.mxu3 %v882_v47  ;;  %267 = vmatpush.msra.mxu2 %v888_v49  ;;  %1183 = vst [vmem:[#allocation25_spill] sm:$0xff] %v920_v60  ;;  %v70_v47 = vld [vmem:[#allocation2 + $0x24] sm:$0xff] }
  0x2a   :  { %247 = vmatpush.msra.mxu1 %v892_v50  ;;  %228 = vmatpush.msra.mxu0 %v898_v52  ;;  %1184 = vst [vmem:[#allocation26_spill] sm:$0xff] %v924_v61  ;;  %v932_v49 = vld [vmem:[#allocation6 + $0x80] sm:$0xff] }
  0x2b   :  { %287 = vmatpush.msra.mxu3 %v894_v51  ;;  %268 = vmatpush.msra.mxu2 %v900_v53  ;;  %v928_v51 = vld [vmem:[#allocation6 + $0x278] sm:$0xff]  ;;  %188 = vst [vmem:[#allocation1] ss:$4 sm:$0xff] %v64_v62  ;;  %v946_v62 = vld [vmem:[#allocation6 + $0x268] sm:$0xff] }
  0x2c   :  { %248 = vmatpush.msra.mxu1 %v904_v54  ;;  %229 = vmatpush.msra.mxu0 %v910_v56  ;;  %v68_v53 = vld [vmem:[#allocation2 + $0x18] sm:$0xff]  ;;  %190 = vst [vmem:[#allocation1 + $0x1] ss:$4 sm:$0xff] %v66_v63  ;;  %v948_v63 = vld [vmem:[#allocation6 + $0x2f0] sm:$0xff] }
  0x2d   :  { %288 = vmatpush.msra.mxu3 %v906_v55  ;;  %269 = vmatpush.msra.mxu2 %v912_v57  ;;  %v934_v55 = vld [vmem:[#allocation6 + $0x180] sm:$0xff]  ;;  %v940_v57 = vld [vmem:[#allocation6 + $0x2f8] sm:$0xff]  ;;  %192 = vst [vmem:[#allocation1 + $0x2] ss:$4 sm:$0xff] %v68_v53  ;;  %v954_v53 = vld [vmem:[#allocation6 + $0x2e8] sm:$0xff] }
  0x2e   :  { %249 = vmatpush.msra.mxu1 %v918_v59  ;;  %1185 = vst [vmem:[#allocation27_spill] sm:$0xff] %v934_v55  ;;  %230 = vmatpush.msra.mxu0 %v916_v58 }
  0x2f   :  { %289 = vmatpush.msra.mxu3 %v920_v60  ;;  %270 = vmatpush.msra.mxu2 %v924_v61  ;;  %194 = vst [vmem:[#allocation1 + $0x3] ss:$4 sm:$0xff] %v70_v47  ;;  %v950_v60 = vld [vmem:[#allocation6 + $0x260] sm:$0xff]  ;;  %v65_v61 = vld [vmem:[#allocation2 + $0x8] sm:$0xf] }
  0x30   :  { %295 = vmatpush.msrb.mxu0 %v928_v51  ;;  %250 = vmatpush.msra.mxu1 %v932_v49  ;;  %v71_v47 = vld [vmem:[#allocation2 + $0x2c] sm:$0xf]  ;;  %196 = vst [vmem:[#allocation1 + $0x20] ss:$4 sm:$0xff] %v65_v61  ;;  %v74_v61 = vld [vmem:[#allocation4 + $0xc] sm:$0xff] }
  0x31   :  { %370 = vmatpush.msrb.mxu2 %v746_v0  ;;  %290 = vmatpush.msra.mxu3 %v934_v55  ;;  %v69_v0 = vld [vmem:[#allocation2 + $0x20] sm:$0xf]  ;;  %v960_v55 = vld [vmem:[#allocation6 + $0x258] sm:$0xff]  ;;  %198 = vst [vmem:[#allocation1 + $0x21] ss:$4 sm:$0xff] %v67_v45 }
  0x32   :  { %296 = vmatpush.msrb.mxu0 %v938_v43  ;;  %315 = vmatpush.msrb.mxu1 %v940_v57  ;;  %200 = vst [vmem:[#allocation1 + $0x22] ss:$4 sm:$0xff] %v69_v0 }
  0x33   :  { %371 = vmatpush.msrb.mxu2 %v750_v2  ;;  %390 = vmatpush.msrb.mxu3 %v754_v3  ;;  %v968_v2 = vld [vmem:[#allocation6 + $0x2d8] sm:$0xff]  ;;  %v72_v3 = vld [vmem:[#allocation4] sm:$0xff]  ;;  %202 = vst [vmem:[#allocation1 + $0x23] ss:$4 sm:$0xff] %v71_v47 }
  0x34   :  { %297 = vmatpush.msrb.mxu0 %v946_v62  ;;  %316 = vmatpush.msrb.mxu1 %v948_v63  ;;  %v984_v47 = vld [vmem:[#allocation6 + $0x2d0] sm:$0xff] }
  0x35   :  { %372 = vmatpush.msrb.mxu2 %v762_v6  ;;  %391 = vmatpush.msrb.mxu3 %v764_v7 }
  0x36   :  { %298 = vmatpush.msrb.mxu0 %v950_v60  ;;  %317 = vmatpush.msrb.mxu1 %v954_v53  ;;  %v205_v6 = vld.sshfl [vmem:[#allocation1 + $0x10] sm:$0xff pattern:$0x73625140]  ;;  %v974_v45 = vld.sshfl [vmem:[#allocation1] sm:$0xff pattern:$0x73625140] }
  0x37   :  { %373 = vmatpush.msrb.mxu2 %v776_v11  ;;  %392 = vmatpush.msrb.mxu3 %v772_v10  ;;  %v206_v7 = vld.sshfl [vmem:[#allocation1 + $0x18] sm:$0xff pattern:$0x73625140]  ;;  %v978_v0 = vld.sshfl [vmem:[#allocation1 + $0x8] sm:$0xff pattern:$0x73625140] }
  0x38   :  { %299 = vmatpush.msrb.mxu0 %v960_v55  ;;  %318 = vmatpush.msrb.mxu1 %v962_v39  ;;  %v78_v11 = vld [vmem:[#allocation4 + $0x24] sm:$0xff]  ;;  %343 = vst [vmem:[#allocation1] ss:$4 sm:$0xff] %v72_v3  ;;  %v988_v10 = vld [vmem:[#allocation6 + $0x240] sm:$0xff] }
  0x39   :  { %374 = vmatpush.msrb.mxu2 %v790_v16  ;;  %393 = vmatpush.msrb.mxu3 %v784_v14  ;;  %345 = vst [vmem:[#allocation1 + $0x1] ss:$4 sm:$0xff] %v74_v61  ;;  %v994_v14 = vld [vmem:[#allocation6 + $0x238] sm:$0xff]  ;;  %v996_v16 = vld [vmem:[#allocation6 + $0x2c0] sm:$0xff] }
  0x3a   :  { %300 = vmatpush.msrb.mxu0 %v966_v41  ;;  %319 = vmatpush.msrb.mxu1 %v968_v2  ;;  %347 = vst [vmem:[#allocation1 + $0x2] ss:$4 sm:$0xff] %v76_v35  ;;  %v75_v3 = vld [vmem:[#allocation4 + $0x14] sm:$0xf]  ;;  %v1008_v35 = vld [vmem:[#allocation6 + $0x230] sm:$0xff] }
  0x3b   :  { %375 = vmatpush.msrb.mxu2 %v802_v20  ;;  %394 = vmatpush.msrb.mxu3 %v796_v18  ;;  %349 = vst [vmem:[#allocation1 + $0x3] ss:$4 sm:$0xff] %v78_v11  ;;  %v207_v20 = vld.sshfl [vmem:[#allocation1 + $0x20] sm:$0xff pattern:$0x73625140] }
  0x3c   :  { %301 = vmatpush.msrb.mxu0 %v982_v37  ;;  %320 = vmatpush.msrb.mxu1 %v984_v47  ;;  %v1002_v61 = vld.sshfl [vmem:[#allocation1 + $0x28] sm:$0xff pattern:$0x73625140]  ;;  %v79_v18 = vld [vmem:[#allocation4 + $0x2c] sm:$0xf] }
  0x3d   :  { %376 = vmatpush.msrb.mxu2 %v814_v24  ;;  %395 = vmatpush.msrb.mxu3 %v808_v22  ;;  %351 = vst [vmem:[#allocation1 + $0x20] ss:$4 sm:$0xff] %v73_v33  ;;  %v1010_v11 = vld [vmem:[#allocation6 + $0x2b8] sm:$0xff]  ;;  %v1016_v22 = vld [vmem:[#allocation6 + $0x228] sm:$0xff]  ;;  %v1018_v24 = vld [vmem:[#allocation6 + $0x2b0] sm:$0xff] }
  0x3e   :  { %302 = vmatpush.msrb.mxu0 %v988_v10  ;;  %321 = vmatpush.msrb.mxu1 %v990_v31  ;;  %353 = vst [vmem:[#allocation1 + $0x21] ss:$4 sm:$0xff] %v75_v3  ;;  %v1044_v33 = vld [vmem:[#allocation6 + $0x298] sm:$0xff] }
  0x3f   :  { %377 = vmatpush.msrb.mxu2 %v826_v28  ;;  %396 = vmatpush.msrb.mxu3 %v820_v26  ;;  %355 = vst [vmem:[#allocation1 + $0x22] ss:$4 sm:$0xff] %v77_v27  ;;  %v1024_v26 = vld [vmem:[#allocation6 + $0x220] sm:$0xff]  ;;  %v1028_v27 = vld [vmem:[#allocation6 + $0x2a8] sm:$0xff]  ;;  %v1033_v28 = vld [vmem:[#allocation6 + $0x218] sm:$0xff] }
  0x40   :  { %303 = vmatpush.msrb.mxu0 %v994_v14  ;;  %322 = vmatpush.msrb.mxu1 %v996_v16  ;;  %357 = vst [vmem:[#allocation1 + $0x23] ss:$4 sm:$0xff] %v79_v18 }
  0x41   :  { %378 = vmatpush.msrb.mxu2 %v838_v32  ;;  %397 = vmatpush.msrb.mxu3 %v832_v30  ;;  %v1037_v30 = vld [vmem:[#allocation6 + $0x2a0] sm:$0xff]  ;;  %v1042_v32 = vld [vmem:[#allocation6 + $0x210] sm:$0xff] }
  0x42   :  { %304 = vmatpush.msrb.mxu0 %v1008_v35  ;;  %323 = vmatpush.msrb.mxu1 %v1010_v11 }
  0x43   :  { %379 = vmatpush.msrb.mxu2 %v850_v36  ;;  %398 = vmatpush.msrb.mxu3 %v844_v34  ;;  %v1050_v34 = vld [vmem:[#allocation6 + $0x208] sm:$0xff]  ;;  %v1052_v36 = vld [vmem:[#allocation6 + $0x290] sm:$0xff] }
  0x44   :  { %305 = vmatpush.msrb.mxu0 %v1016_v22  ;;  %324 = vmatpush.msrb.mxu1 %v1018_v24 }
  0x45   :  { %380 = vmatpush.msrb.mxu2 %v862_v40  ;;  %399 = vmatpush.msrb.mxu3 %v856_v38  ;;  %v1058_v38 = vld [vmem:[#allocation6 + $0x200] sm:$0xff]  ;;  %v1060_v40 = vld [vmem:[#allocation6 + $0x288] sm:$0xff] }
  0x46   :  { %271 = vmatmul.f32.vlgmr.msra.gmra.mxu2 %v205_v6  ;;  %306 = vmatpush.msrb.mxu0 %v1024_v26 }
  0x47   :  { %325 = vmatpush.msrb.mxu1 %v1028_v27  ;;  %381 = vmatpush.msrb.mxu2 %v874_v44  ;;  %v363_v44 = vld.sshfl [vmem:[#allocation1 + $0x28] sm:$0xff pattern:$0x73625140] }
  0x48   :  { %400 = vmatpush.msrb.mxu3 %v868_v42  ;;  %231 = vmatmul.f32.vlgmr.msra.gmra.mxu0 %v974_v45  ;;  %v1068_v42 = vld [vmem:[#allocation6 + $0x280] sm:$0xff] }
  0x49   :  { %291 = vmatmul.f32.vlgmr.msra.gmra.mxu3 %v206_v7  ;;  %307 = vmatpush.msrb.mxu0 %v1033_v28 }
  0x4a   :  { %326 = vmatpush.msrb.mxu1 %v1037_v30  ;;  %382 = vmatpush.msrb.mxu2 %v886_v48  ;;  %v1202_v48 = vld [vmem:[#allocation25_spill] sm:$0xff] }
  0x4b   :  { %401 = vmatpush.msrb.mxu3 %v880_v46  ;;  %251 = vmatmul.f32.vlgmr.msra.gmra.mxu1 %v978_v0  ;;  %v1201_v46 = vld [vmem:[#allocation26_spill] sm:$0xff] }
  0x4c   :  { %308 = vmatpush.msrb.mxu0 %v1042_v32  ;;  %327 = vmatpush.msrb.mxu1 %v1044_v33 }
  0x4d   :  { %383 = vmatpush.msrb.mxu2 %v898_v52  ;;  %402 = vmatpush.msrb.mxu3 %v892_v50  ;;  %v1203_v50 = vld [vmem:[#allocation27_spill] sm:$0xff] }
  0x4e   :  { %309 = vmatpush.msrb.mxu0 %v1050_v34  ;;  %328 = vmatpush.msrb.mxu1 %v1052_v36 }
  0x4f   :  { %384 = vmatpush.msrb.mxu2 %v910_v56  ;;  %403 = vmatpush.msrb.mxu3 %v904_v54 }
  0x50   :  { %310 = vmatpush.msrb.mxu0 %v1058_v38  ;;  %329 = vmatpush.msrb.mxu1 %v1060_v40 }
  0x51   :  { %385 = vmatpush.msrb.mxu2 %v916_v58  ;;  %404 = vmatpush.msrb.mxu3 %v918_v59 }
  0x52   :  { %311 = vmatmul.f32.vlgmr.msrb.gmra.mxu0 %v207_v20  ;;  %330 = vmatpush.msrb.mxu1 %v1068_v42 }
  0x53   :  { %450 = vmatpush.msra.mxu2 %v928_v51  ;;  %405 = vmatpush.msrb.mxu3 %v932_v49  ;;  %v361_v49 = vld.sshfl [vmem:[#allocation1 + $0x18] sm:$0xff pattern:$0x73625140]  ;;  %v618_v51 = vld [vmem:[%s1148_s3] ss:$0 sm:$0xff] }
  0x54   :  { %331 = vmatmul.f32.vlgmr.msrb.gmra.mxu1 %v1002_v61  ;;  %410 = vmatpush.msra.mxu0 %v748_v1  ;;  %v1186_v1 = vld [vmem:[#allocation10_spill] sm:$0xff] }
  0x55   :  { %451 = vmatpush.msra.mxu2 %v938_v43  ;;  %470 = vmatpush.msra.mxu3 %v940_v57  ;;  %v360_v43 = vld.sshfl [vmem:[#allocation1 + $0x10] sm:$0xff pattern:$0x73625140] }
  0x56   :  { %411 = vmatpush.msra.mxu0 %v756_v4  ;;  %430 = vmatpush.msra.mxu1 %v758_v5  ;;  %v1187_v4 = vld [vmem:[#allocation12_spill] sm:$0xff]  ;;  %v1188_v5 = vld [vmem:[#allocation11_spill] sm:$0xff] }
  0x57   :  { %452 = vmatpush.msra.mxu2 %v946_v62  ;;  %471 = vmatpush.msra.mxu3 %v948_v63 }
  0x58   :  { %412 = vmatpush.msra.mxu0 %v766_v8  ;;  %431 = vmatpush.msra.mxu1 %v770_v9  ;;  %v1189_v8 = vld [vmem:[#allocation14_spill] sm:$0xff]  ;;  %v1190_v9 = vld [vmem:[#allocation13_spill] sm:$0xff] }
  0x59   :  { %453 = vmatpush.msra.mxu2 %v950_v60  ;;  %472 = vmatpush.msra.mxu3 %v954_v53 }
  0x5a   :  { %413 = vmatpush.msra.mxu0 %v778_v12  ;;  %432 = vmatpush.msra.mxu1 %v780_v13  ;;  %v358_v12 = vld.sshfl [vmem:[#allocation1] sm:$0xff pattern:$0x73625140] }
  0x5b   :  { %454 = vmatpush.msra.mxu2 %v960_v55  ;;  %473 = vmatpush.msra.mxu3 %v962_v39  ;;  %v1191_v13 = vld [vmem:[#allocation16_spill] sm:$0xff] }
  0x5c   :  { %414 = vmatpush.msra.mxu0 %v792_v17  ;;  %433 = vmatpush.msra.mxu1 %v786_v15  ;;  %v1192_v15 = vld [vmem:[#allocation15_spill] sm:$0xff]  ;;  %v1193_v17 = vld [vmem:[#allocation18_spill] sm:$0xff]  ;;  %v1199_v39 = vld [vmem:[#allocation24_spill] sm:$0xff] }
  0x5d   :  { %455 = vmatpush.msra.mxu2 %v966_v41  ;;  %474 = vmatpush.msra.mxu3 %v968_v2  ;;  %v1200_v41 = vld [vmem:[#allocation23_spill] sm:$0xff] }
  0x5e   :  { %415 = vmatpush.msra.mxu0 %v804_v21  ;;  %434 = vmatpush.msra.mxu1 %v798_v19  ;;  %v359_v19 = vld.sshfl [vmem:[#allocation1 + $0x8] sm:$0xff pattern:$0x73625140] }
  0x5f   :  { %456 = vmatpush.msra.mxu2 %v982_v37  ;;  %475 = vmatpush.msra.mxu3 %v984_v47  ;;  %v1194_v21 = vld [vmem:[#allocation17_spill] sm:$0xff]  ;;  %v362_v37 = vld.sshfl [vmem:[#allocation1 + $0x20] sm:$0xff pattern:$0x73625140] }
  0x60   :  { %416 = vmatpush.msra.mxu0 %v816_v25  ;;  %435 = vmatpush.msra.mxu1 %v810_v23  ;;  %v1195_v23 = vld [vmem:[#allocation20_spill] sm:$0xff]  ;;  %v1196_v25 = vld [vmem:[#allocation19_spill] sm:$0xff] }
  0x61   :  { %457 = vmatpush.msra.mxu2 %v988_v10  ;;  %476 = vmatpush.msra.mxu3 %v990_v31  ;;  %v1198_v31 = vld [vmem:[#allocation21_spill] sm:$0xff] }
  0x62   :  { %417 = vmatpush.msra.mxu0 %v828_v29  ;;  %436 = vmatpush.msra.mxu1 %v1186_v1  ;;  %v1197_v29 = vld [vmem:[#allocation22_spill] sm:$0xff] }
  0x63   :  { %458 = vmatpush.msra.mxu2 %v994_v14  ;;  %477 = vmatpush.msra.mxu3 %v996_v16 }
  0x64   :  { %418 = vmatpush.msra.mxu0 %v1187_v4  ;;  %437 = vmatpush.msra.mxu1 %v1188_v5 }
  0x65   :  { %459 = vmatpush.msra.mxu2 %v1008_v35  ;;  %478 = vmatpush.msra.mxu3 %v1010_v11 }
  0x66   :  { %419 = vmatpush.msra.mxu0 %v1189_v8  ;;  %438 = vmatpush.msra.mxu1 %v1190_v9 }
  0x67   :  { %460 = vmatpush.msra.mxu2 %v1016_v22  ;;  %479 = vmatpush.msra.mxu3 %v1018_v24 }
  0x68   :  { %420 = vmatpush.msra.mxu0 %v1191_v13  ;;  %439 = vmatpush.msra.mxu1 %v1192_v15 }
  0x69   :  { %461 = vmatpush.msra.mxu2 %v1024_v26  ;;  %480 = vmatpush.msra.mxu3 %v1028_v27 }
  0x6a   :  { %386 = vmatmul.f32.vlgmr.msrb.gmra.mxu2 %v358_v12  ;;  %421 = vmatpush.msra.mxu0 %v1193_v17 }
  0x6b   :  { %440 = vmatpush.msra.mxu1 %v1194_v21  ;;  %462 = vmatpush.msra.mxu2 %v1033_v28 }
  0x6c   :  { %481 = vmatpush.msra.mxu3 %v1037_v30  ;;  %422 = vmatpush.msra.mxu0 %v1195_v23 }
  0x6d   :  { %406 = vmatmul.f32.vlgmr.msrb.gmra.mxu3 %v359_v19  ;;  %441 = vmatpush.msra.mxu1 %v1196_v25 }
  0x6e   :  { %463 = vmatpush.msra.mxu2 %v1042_v32  ;;  %482 = vmatpush.msra.mxu3 %v1044_v33 }
  0x6f   :  { %423 = vmatpush.msra.mxu0 %v1197_v29  ;;  %442 = vmatpush.msra.mxu1 %v1198_v31 }
  0x70   :  { %464 = vmatpush.msra.mxu2 %v1050_v34  ;;  %483 = vmatpush.msra.mxu3 %v1052_v36 }
  0x71   :  { %424 = vmatpush.msra.mxu0 %v1199_v39  ;;  %443 = vmatpush.msra.mxu1 %v1200_v41 }
  0x72   :  { %465 = vmatpush.msra.mxu2 %v1058_v38  ;;  %484 = vmatpush.msra.mxu3 %v1060_v40 }
  0x73   :  { %466 = vmatmul.f32.vlgmr.msra.gmra.mxu2 %v362_v37  ;;  %425 = vmatpush.msra.mxu0 %v1201_v46 }
  0x74   :  { %444 = vmatpush.msra.mxu1 %v1202_v48  ;;  %485 = vmatpush.msra.mxu3 %v1068_v42 }
  0x75   :  { %426 = vmatmul.f32.vlgmr.msra.gmra.mxu0 %v360_v43  ;;  %486 = vmatmul.f32.vlgmr.msra.gmra.mxu3 %v363_v44 }
  0x76   :  { %445 = vmatpush.msra.mxu1 %v1203_v50 }
  0x77   :  { %446 = vmatmul.f32.vlgmr.msra.gmra.mxu1 %v361_v49 }
  0xc5   :  { %v232_v52 = vpop.f32.mrf.mxu0 }
  0xc6   :  { %v233_v54 = vadd.f32 %v618_v51, %v232_v52 }
  0xc8   :  { %v252_v55 = vpop.f32.mrf.mxu1 }
  0xc9   :  { %v253_v56 = vadd.f32 %v252_v55, %v233_v54  ;;  %v272_v57 = vpop.f32.mrf.mxu2 }
  0xcb   :  { %v273_v58 = vadd.f32 %v272_v57, %v253_v56 }
  0xcc   :  { %v292_v59 = vpop.f32.mrf.mxu3 }
  0xcd   :  { %v293_v60 = vadd.f32 %v292_v59, %v273_v58 }
  0xcf   :  { %v312_v62 = vpop.f32.mrf.mxu0 }
  0xd0   :  { %v313_v63 = vadd.f32 %v312_v62, %v293_v60 }
  0xd1   :  { %v332_v53 = vpop.f32.mrf.mxu1 }
  0xd2   :  { %v333_v2 = vadd.f32 %v332_v53, %v313_v63 }
  0xd4   :  { %v493_v6 = vmul.f32 %v333_v2, %v333_v2 }
  0xd6   :  { %494 = vadd.xlane.f32.xlu0 %v493_v6 }
  0xed   :  { %v387_v45 = vpop.f32.mrf.mxu2 }
  0xee   :  { %v388_v7 = vadd.f32 %v618_v51, %v387_v45 }
  0xf0   :  { %v407_v0 = vpop.f32.mrf.mxu3 }
  0xf1   :  { %v408_v47 = vadd.f32 %v407_v0, %v388_v7 }
  0xf2   :  { %v427_v10 = vpop.f32.mrf.mxu0 }
  0xf3   :  { %v428_v14 = vadd.f32 %v427_v10, %v408_v47 }
  0xf4   :  { %v447_v16 = vpop.f32.mrf.mxu1 }
  0xf5   :  { %v448_v3 = vadd.f32 %v447_v16, %v428_v14 }
  0xf6   :  { %v467_v20 = vpop.f32.mrf.mxu2 }
  0xf7   :  { %v468_v61 = vadd.f32 %v467_v20, %v448_v3 }
  0xf8   :  { %v487_v18 = vpop.f32.mrf.mxu3 }
  0xf9   :  { %v488_v35 = vadd.f32 %v487_v18, %v468_v61 }
  0xfb   :  { %v496_v11 = vmul.f32 %v488_v35, %v488_v35  ;;  %v490_v22 = vmul.f32 %v488_v35, %v333_v2 }
  0xfd   :  { %497 = vadd.xlane.f32.xlu0 %v496_v11  ;;  %491 = vadd.xlane.f32.xlu1 %v490_v22 }
 0x149   :  { %v495_v24 = vpop.xlane.xlu0 %494 }
 0x14a   :  { %619 = vrsqrt.f32 %v495_v24  ;;  %v499_v26 = vmax.f32 %v495_v24, 1e-24  ;;  %vm530_vm2 = vcmp.eq.f32.partialorder %v495_v24, inf  ;;  %v533_v41 = vand.u32 2147483648, %v495_v24 }
 0x14b   :  { %vm532_vm6 = vcmp.eq.f32.partialorder %v495_v24, 0.0 }
 0x14c   :  { %621 = vrsqrt.f32 %v499_v26  ;;  %vm506_vm0 = vweird.f32 %v499_v26 }
 0x150   :  { %v620_v27 = vpop.eup %619 }
 0x151   :  { %v524_v28 = vmul.f32 %v620_v27, %v495_v24 }
 0x152   :  { %v622_v30 = vpop.eup %621 }
 0x153   :  { %v525_v32 = vmul.f32 %v620_v27, %v524_v28  ;;  %v501_v33 = vmul.f32 %v622_v30, %v499_v26  ;;  %vm507_vm1 = vweird.f32 %v622_v30 }
 0x154   :  { %vm508_vm4 = vmor %vm506_vm0, %vm507_vm1 }
 0x155   :  { %v526_v36 = vmul.f32 0.5, %v525_v32  ;;  %v502_v40 = vmul.f32 %v622_v30, %v501_v33 }
 0x157   :  { %v527_v42 = vsub.f32 1.5, %v526_v36  ;;  %v503_v4 = vmul.f32 0.5, %v502_v40 }
 0x159   :  { %v528_v8 = vmul.f32 %v620_v27, %v527_v42  ;;  %v504_v15 = vsub.f32 1.5, %v503_v4 }
 0x15b   :  { %v529_v19 = vmul.f32 %v528_v8, %v495_v24  ;;  %v505_v29 = vmul.f32 %v622_v30, %v504_v15 }
 0x15d   :  { %v531_v37 = vsel %vm530_vm2, %v495_v24, %v529_v19  ;;  %v509_v46 = vsel %vm508_vm4, %v622_v30, %v505_v29 }
 0x15e   :  { %v534_v48 = vsel %vm532_vm6, %v533_v41, %v531_v37 }
 0x15f   :  { %v535_v54 = vmul.f32 %v534_v48, %v509_v46 }
 0x170   :  { %v498_v34 = vpop.xlane.xlu0 %497  ;;  %v492_v63 = vpop.xlane.xlu1 %491 }
 0x171   :  { %623 = vrsqrt.f32 %v498_v34  ;;  %v510_v38 = vmax.f32 %v498_v34, 1e-24  ;;  %vm543_vm8 = vcmp.eq.f32.partialorder %v498_v34, inf  ;;  %v546_v49 = vand.u32 2147483648, %v498_v34 }
 0x172   :  { %vm545_vm9 = vcmp.eq.f32.partialorder %v498_v34, 0.0  ;;  %v521_v45 = vmul.f32 %v509_v46, %v492_v63 }
 0x173   :  { %625 = vrsqrt.f32 %v510_v38  ;;  %vm517_vm5 = vweird.f32 %v510_v38 }
 0x177   :  { %v624_v1 = vpop.eup %623 }
 0x178   :  { %v537_v5 = vmul.f32 %v624_v1, %v498_v34 }
 0x179   :  { %v626_v9 = vpop.eup %625 }
 0x17a   :  { %v512_v12 = vmul.f32 %v626_v9, %v510_v38  ;;  %v538_v13 = vmul.f32 %v624_v1, %v537_v5  ;;  %vm518_vm3 = vweird.f32 %v626_v9 }
 0x17b   :  { %vm519_vm7 = vmor %vm517_vm5, %vm518_vm3 }
 0x17c   :  { %v513_v17 = vmul.f32 %v626_v9, %v512_v12  ;;  %v539_v21 = vmul.f32 0.5, %v538_v13 }
 0x17e   :  { %v514_v23 = vmul.f32 0.5, %v513_v17  ;;  %v540_v25 = vsub.f32 1.5, %v539_v21 }
 0x180   :  { %v515_v31 = vsub.f32 1.5, %v514_v23  ;;  %v541_v39 = vmul.f32 %v624_v1, %v540_v25 }
 0x182   :  { %v516_v43 = vmul.f32 %v626_v9, %v515_v31  ;;  %v542_v44 = vmul.f32 %v541_v39, %v498_v34 }
 0x184   :  { %v520_v50 = vsel %vm519_vm7, %v626_v9, %v516_v43  ;;  %v544_v51 = vsel %vm543_vm8, %v498_v34, %v542_v44 }
 0x185   :  { %v547_v52 = vsel %vm545_vm9, %v546_v49, %v544_v51  ;;  %v522_v47 = vmul.f32 %v521_v45, %v520_v50 }
 0x186   :  { %v548_v55 = vmul.f32 %v547_v52, %v520_v50 }
 0x188   :  { %v549_v56 = vmul.f32 %v548_v55, %v535_v54 }
 0x18a   :  { %v550_v57 = vmax.f32 %v549_v56, 1e-08 }
 0x18c   :  { %627 = vrcp.f32 %v550_v57  ;;  %v562_v62 = vand.u32 2147483648, %v550_v57  ;;  %v560_v2 = vand.u32 2147483647, %v550_v57  ;;  %vm556_vm11 = vweird.f32 %v550_v57 }
 0x18e   :  { %v563_v7 = vor.u32 1.1754944e-38, %v562_v62  ;;  %vm561_vm13 = vcmp.eq.f32.partialorder %v560_v2, 8.507059e+37 }
 0x192   :  { %v628_v58 = vpop.eup %627 }
 0x193   :  { %v552_v59 = vmul.f32 %v628_v58, %v550_v57  ;;  %vm557_vm10 = vweird.f32 %v628_v58 }
 0x194   :  { %vm558_vm12 = vmor %vm556_vm11, %vm557_vm10 }
 0x195   :  { %v553_v60 = vsub.f32 1.0, %v552_v59 }
 0x197   :  { %v554_v53 = vmul.f32 %v628_v58, %v553_v60 }
 0x199   :  { %v555_v6 = vadd.f32 %v628_v58, %v554_v53 }
 0x19b   :  { %v559_v0 = vsel %vm558_vm12, %v628_v58, %v555_v6 }
 0x19c   :  { %v564_v10 = vsel %vm561_vm13, %v563_v7, %v559_v0 }
 0x19d   :  { %v565_v14 = vmul.f32 %v564_v10, %v522_v47 }
 0x19f   :  { %567 = vst.msk [vmem:[#allocation7] sm:$0xff] %vm566_vm14, %v565_v14 }
 0x1a6   :  { %v586_v16 = vld [vmem:[#allocation7] sm:$0x3] }
 0x1a7   :  { %587 = vst [vmem:[%s1149_s4] sm:$0x3] %v586_v16 }
 0x1a8   :  { %605 = vsyncpa [#allocation3], 1 }
 0x1a9   :  { %606 = vsyncpa [#allocation5], 1 }

</bundles_post_ra>
